<compile_context>
chip_gen: v7x
topology: tpu7x:2x2x1
jax: 0.10.0
libtpu: 0.0.40
codegen_flags: <defaults>
</compile_context>

<pallas_src>
import functools

import jax
import jax.numpy as jnp
from jax.experimental import pallas as pl
from jax.experimental.pallas import tpu as pltpu


# ----------------------------------------------------------------------------
# Hardware probes (cached, with safe fallbacks).
# ----------------------------------------------------------------------------

@functools.lru_cache(maxsize=None)
def _device_kind() -> str:
    try:
        return jax.devices()[0].device_kind.lower()
    except Exception:
        return ""


@functools.lru_cache(maxsize=None)
def _vmem_capacity_bytes() -> int:
    """Physical per-core VMEM: v5e/v6e 128 MiB, v7x 64 MiB (conservative else)."""
    try:
        cap = int(getattr(pltpu.get_tpu_info(), "vmem_capacity_bytes", 0) or 0)
        if cap > 0:
            return cap
    except Exception:
        pass
    kind = _device_kind()
    if "v7" in kind:
        return 64 << 20
    if "v5" in kind or "v6" in kind:
        return 128 << 20
    if "v2" in kind or "v3" in kind:
        return 16 << 20
    return 64 << 20


@functools.lru_cache(maxsize=None)
def _num_tensorcores() -> int:
    try:
        dev = jax.devices()[0]
        n = getattr(dev, "num_cores", None) or getattr(dev, "core_count", None)
        return int(n) if n else 1
    except Exception:
        return 1


@functools.lru_cache(maxsize=None)
def _roll_is_numpy_convention() -> bool:
    """One-time probe: does pltpu.roll(x, s, axis)[..., k] == x[..., k - s]?

    Guarding on this keeps the kernel correct even if the rotate's direction
    convention differs across toolchain versions (a roll by size - s in the
    opposite convention is identical to a roll by s in this one).
    """
    def probe(x_ref, o_ref):
        o_ref[...] = pltpu.roll(x_ref[...], shift=1, axis=1)

    x = jnp.tile(jnp.arange(128, dtype=jnp.float32)[None, :], (8, 1))
    y = pl.pallas_call(
        probe, out_shape=jax.ShapeDtypeStruct((8, 128), jnp.float32))(x)
    return bool(y[0, 1] == 0.0)


def _round_up(x: int, m: int) -> int:
    return ((x + m - 1) // m) * m


# ----------------------------------------------------------------------------
# Tiling
# ----------------------------------------------------------------------------

def _choose_tile_planes(n_planes_p: int, plane_bytes: int,
                        budget_bytes: int, min_blocks: int) -> int:
    """Planes per grid step.

    Legal sublane block sizes are multiples of 8 dividing n_planes_p (the
    wrapper pads n_planes_p to a multiple of 8, so the full extent qualifies).
    Prefer the largest tile that (a) fits the per-input byte budget and
    (b) leaves >= min_blocks grid steps (DMA/compute overlap + megacore split).
    If (b) is unreachable, maximize the block count among budget-fitting tiles;
    if nothing fits the budget, fall back to the smallest legal tile.
    """
    cands = [t for t in range(8, n_planes_p + 1, 8) if n_planes_p % t == 0]
    fits = [t for t in cands if t * plane_bytes <= budget_bytes]
    pipelined = [t for t in fits if n_planes_p // t >= min_blocks]
    if pipelined:
        return max(pipelined)
    if fits:
        return min(fits)   # as many grid steps as the plane count allows
    # TODO(synk): lane-axis tiling with a W-element halo for very large planes.
    return min(cands)


# ----------------------------------------------------------------------------
# Kernel
# ----------------------------------------------------------------------------

def _basic_loss_kernel(pred_ref, gt_ref, ml_ref, mu_ref, out_ref, *,
                       s_left, s_up, compute_dtype):
    # Native-dtype loads; bf16 inputs stay bf16 for the elementwise math on
    # v6e/v7x (compute_dtype), everything else is upcast to f32 in-register.
    p = pred_ref[...].astype(compute_dtype)     # (TP, plane_p), lane-dense
    g = gt_ref[...].astype(compute_dtype)
    ml = ml_ref[...]                            # (1, plane_p) 0/1 mask, resident
    mu = mu_ref[...]                            # (1, plane_p) 0/1 mask, resident

    def l1_gradient(x):
        # |x[i, j-1] - x[i, j]| + |x[i-1, j] - x[i, j]| with zero padding:
        # XLU lane rolls + one precomputed-mask multiply each (no iota/mod/cmp).
        left = pltpu.roll(x, shift=s_left, axis=1) * ml
        up = pltpu.roll(x, shift=s_up, axis=1) * mu
        return jnp.abs(left - x) + jnp.abs(up - x)

    diff = p - g
    val = jnp.abs(l1_gradient(p) - l1_gradient(g)) + diff * diff
    # One f32 partial sum per (b, c) plane; the tiny cross-plane reduction and
    # the 1/N scaling happen in JAX.
    out_ref[...] = jnp.sum(val.astype(jnp.float32), axis=1, keepdims=True)


# ----------------------------------------------------------------------------
# Wrapper
# ----------------------------------------------------------------------------

def basic_loss(pred, gt):
    assert pred.shape == gt.shape and pred.ndim == 4
    B, C, H, W = pred.shape
    n_planes = B * C
    plane = H * W
    # L1Loss(grad, grad) and MSELoss average over the same element count, so a
    # single combined sum scaled by 1/N reproduces the total loss.
    inv_n = 1.0 / float(n_planes * plane)

    kind = _device_kind()
    vmem_cap = _vmem_capacity_bytes()
    bf16_math_ok = ("v6" in kind) or ("v7" in kind)   # bf16-capable VPU
    compute_dtype = (jnp.bfloat16
                     if (pred.dtype == jnp.bfloat16 and bf16_math_ok)
                     else jnp.float32)

    # Lane-dense, (8,128)-legal padded view: one row per (b, c) plane.
    plane_p = _round_up(plane, 128)
    n_planes_p = _round_up(n_planes, 8)
    pr = pred.reshape(n_planes, plane)
    gr = gt.reshape(n_planes, plane)
    if plane_p != plane or n_planes_p != n_planes:
        pad = ((0, n_planes_p - n_planes), (0, plane_p - plane))
        pr = jnp.pad(pr, pad)   # zero planes / masked tail contribute exactly 0
        gr = jnp.pad(gr, pad)

    # Precomputed boundary masks (DMA'd once, kept resident via constant index_map).
    k = jnp.arange(plane_p, dtype=jnp.int32)
    valid = k < plane
    mask_left = (((k % W) != 0) & valid).astype(compute_dtype).reshape(1, plane_p)
    mask_up = ((k >= W) & valid).astype(compute_dtype).reshape(1, plane_p)

    # Per-generation tiling: ~2-4 MiB input blocks, >= max(4, 2*TC) grid steps.
    in_itemsize = pred.dtype.itemsize
    budget = max(1 << 20, min(4 << 20, vmem_cap // 24))
    min_blocks = max(4, 2 * _num_tensorcores())
    tp = _choose_tile_planes(n_planes_p, plane_p * in_itemsize, budget, min_blocks)
    n_blocks = n_planes_p // tp

    # Scoped-VMEM limit sized for the real working set: double-buffered inputs
    # plus the compute-dtype temporaries of the roll / abs / diff chain.
    blk_elems = tp * plane_p
    est = (4 * blk_elems * in_itemsize                       # 2 inputs x 2 buffers
           + 12 * blk_elems * jnp.dtype(compute_dtype).itemsize
           + 8 * plane_p * 4 + (2 << 20))                    # masks, outputs, slack
    vmem_limit = int(min(vmem_cap * 7 // 8, max(32 << 20, est)))

    # Static roll amounts for "previous element" (j-1) and "previous row" (i-1)
    # within a flattened plane; wrapped-around elements are masked to zero.
    s_left = 1 % plane_p
    s_up = W % plane_p
    if not _roll_is_numpy_convention():
        s_left = (plane_p - s_left) % plane_p
        s_up = (plane_p - s_up) % plane_p

    kernel = functools.partial(_basic_loss_kernel, s_left=s_left, s_up=s_up,
                               compute_dtype=compute_dtype)

    partials = pl.pallas_call(
        kernel,
        out_shape=jax.ShapeDtypeStruct((n_planes_p, 1), jnp.float32),
        grid_spec=pltpu.PrefetchScalarGridSpec(
            num_scalar_prefetch=0,
            grid=(n_blocks,),
            in_specs=[
                pl.BlockSpec((tp, plane_p), lambda i: (i, 0)),
                pl.BlockSpec((tp, plane_p), lambda i: (i, 0)),
                pl.BlockSpec((1, plane_p), lambda i: (0, 0)),   # resident mask
                pl.BlockSpec((1, plane_p), lambda i: (0, 0)),   # resident mask
            ],
            out_specs=pl.BlockSpec((tp, 1), lambda i: (i, 0)),
        ),
        compiler_params=pltpu.CompilerParams(
            dimension_semantics=("parallel",),
            vmem_limit_bytes=vmem_limit),
    )(pr, gr, mask_left, mask_up)

    return jnp.sum(partials) * inv_n


# ----------------------------------------------------------------------------
# Pure-JAX reference mirroring the PyTorch module (for verification).
# ----------------------------------------------------------------------------

def _reference_loss(pred, gt):
    def grad(img):
        w, h = img.shape[-2], img.shape[-1]
        l = jnp.pad(img, ((0, 0), (0, 0), (0, 0), (1, 0)))
        r = jnp.pad(img, ((0, 0), (0, 0), (0, 0), (0, 1)))
        u = jnp.pad(img, ((0, 0), (0, 0), (1, 0), (0, 0)))
        d = jnp.pad(img, ((0, 0), (0, 0), (0, 1), (0, 0)))
        return jnp.abs((l - r)[..., :w, :h]) + jnp.abs((u - d)[..., :w, :h])
    return jnp.mean(jnp.abs(grad(pred) - grad(gt))) + jnp.mean((pred - gt) ** 2)


if __name__ == "__main__":
    key = jax.random.PRNGKey(0)
    k1, k2 = jax.random.split(key)
    B, C, H, W = 2, 4, 16, 16
    pred = jax.random.normal(k1, (B, C, H, W), dtype=jnp.float32)
    gt = jax.random.normal(k2, (B, C, H, W), dtype=jnp.float32)

    loss = basic_loss(pred, gt)
    jax.block_until_ready(loss)

    ref = _reference_loss(pred, gt)
    assert jnp.allclose(loss, ref, rtol=1e-4, atol=1e-4), (loss, ref)
    print("KERNEL_OK")
</pallas_src>

<mosaic_0001>
module attributes {stable_mosaic.version = 11 : i64} {
  func.func @probe(%arg0: memref<8x128xf32, #tpu.memory_space<vmem>>, %arg1: memref<8x128xf32, #tpu.memory_space<vmem>>) attributes {dimension_semantics = [], scalar_prefetch = 0 : i64, scratch_operands = 0 : i64, tpu.core_type = #tpu.core_type<tc>} {
    %c0 = arith.constant 0 : index
    %c0_0 = arith.constant 0 : index
    %0 = vector.load %arg0[%c0, %c0_0] : memref<8x128xf32, #tpu.memory_space<vmem>>, vector<8x128xf32>
    %c1_i32 = arith.constant 1 : i32
    %1 = tpu.dynamic_rotate %0 by %c1_i32 dim 1 : vector<8x128xf32>, i32 -> vector<8x128xf32>
    %c0_1 = arith.constant 0 : index
    %c0_2 = arith.constant 0 : index
    %2 = vector.load %arg1[%c0_1, %c0_2] : memref<8x128xf32, #tpu.memory_space<vmem>>, vector<8x128xf32>
    tpu.vector_store %arg1[%c0_1, %c0_2], %1 {strides = array<i32>} : memref<8x128xf32, #tpu.memory_space<vmem>>, vector<8x128xf32>,
    return
  }
}

</mosaic_0001>

<bundles_post_ra>
// kernel: tpu_custom_call.1
= control target key start
LH: loop header
LB: loop body
LE: loop exit
PB: predicated region body
PF: predicated region fallthrough
CT: control target
= control target key end

     0   :  { %6 = vsyncpa [#allocation3], 0  ;;  %s128_s0 = inlined_call_operand.hbm [shape: f32[8,128], index: 0, kind: input, shape index: {}]   ;;  %s129_s1 = inlined_call_operand.hbm [shape: f32[8,128], index: 1, kind: output, shape index: {}]  }
   0x1   :  { %7 = vsyncpa [#allocation4], 0  ;;  %s91_s6 = smov [#allocation2]   ;;  %s43_s10 = scalar_lea.hbm %s128_s0, 128 }
   0x2   :  { %s14_s7 = sshll.u32 %s91_s6, 4  ;;  %p44_p0 = scmp.ne.s32.totalorder %s128_s0, %s43_s10  ;;  %s15_s7 = int_to_ptr.vmem [resolvable:$true] %s14_s7 }
   0x3   :  { %p47_p1 = scmp.lt.u32.totalorder %s43_s10, %s128_s0 }
   0x5   :  { %p49_p2 = pnand %p47_p1, %p44_p0 }
   0x7   :  { %52 = shalt.err (!%p49_p2)
}
   0x8   :  { %s53_s15 = scalar_lea.vmem %s15_s7, 128  ;;  %p58_p4 = scmp.lt.s32.totalorder %s15_s7, %s15_s7 }
   0x9   :  { %p54_p3 = scmp.ne.s32.totalorder %s15_s7, %s53_s15  ;;  %p59_p5 = scmp.lt.s32.totalorder %s53_s15, %s53_s15 }
   0xb   :  { %p60_p6 = por %p59_p5, %p58_p4 }
   0xd   :  { %p61_p7 = pnand %p60_p6, %p54_p3 }
   0xf   :  { %64 = shalt.err (!%p61_p7)
}
  0x10   :  { %17 = dma.hbm_to_vmem [thread:$0]  %s128_s0, 128, %s15_s7, [#allocation3]  }
  0x11   :  { %87 = dma.done.wait [#allocation3], 128  }
  0x12   :  { %88 = vsyncadd [#allocation3], 4294967168  ;;  %v21_v0 = vld [vmem:[#allocation2] sm:$0xff]  ;;  %s92_s18 = smov 1   ;;  %s93_s19 = smov [#allocation5]  }
  0x13   :  { %22 = vrot.lane.b32.xlu0 %v21_v0, %s92_s18  ;;  %s31_s20 = sshll.u32 %s93_s19, 4  ;;  %s32_s20 = int_to_ptr.vmem [resolvable:$true] %s31_s20 }
  0x14   :  { %s65_s21 = scalar_lea.vmem %s32_s20, 128  ;;  %p70_p9 = scmp.lt.s32.totalorder %s32_s20, %s32_s20 }
  0x15   :  { %p66_p8 = scmp.ne.s32.totalorder %s32_s20, %s65_s21  ;;  %p71_p10 = scmp.lt.s32.totalorder %s65_s21, %s65_s21 }
  0x17   :  { %p72_p11 = por %p71_p10, %p70_p9 }
  0x19   :  { %p73_p12 = pnand %p72_p11, %p66_p8 }
  0x85   :  { %v23_v1 = vpop.permute.xlu0 %22 }
  0x86   :  { %24 = vst [vmem:[#allocation5] sm:$0xff] %v23_v1 }
  0x87   :  { %76 = shalt.err (!%p73_p12)
}
  0x88   :  { %s77_s0 = scalar_lea.hbm %s129_s1, 128 }
  0x89   :  { %p78_p13 = scmp.ne.s32.totalorder %s129_s1, %s77_s0  ;;  %p81_p0 = scmp.lt.u32.totalorder %s77_s0, %s129_s1 }
  0x8b   :  { %p83_p1 = pnand %p81_p0, %p78_p13 }
  0x8d   :  { %86 = shalt.err (!%p83_p1)
}
  0x8e   :  { %34 = dma.vmem_to_hbm [thread:$0]  %s32_s20, 128, %s129_s1, [#allocation4]  }
  0x8f   :  { %89 = dma.done.wait [#allocation4], 128  }
  0x90   :  { %90 = vsyncadd [#allocation4], 4294967168 }
  0x91   :  { %38 = vsyncpa [#allocation3], 1 }
  0x92   :  { %39 = vsyncpa [#allocation4], 1 }

</bundles_post_ra>
